<compile_context>
chip_gen: v7x
topology: tpu7x:2x2x1
jax: 0.10.0
libtpu: 0.0.40
codegen_flags: <defaults>
</compile_context>

<pallas_src>
import functools

import numpy as np
import jax
import jax.numpy as jnp
from jax.experimental import pallas as pl
from jax.experimental.pallas import tpu as pltpu


# ----------------------------- helpers --------------------------------------


def _gelu_exact(x):
    # Exact (erf-based) GELU as in torch.nn.GELU(); erf via Abramowitz &
    # Stegun 7.1.26 (|abs err| < 1.5e-7), elementwise VPU/EUP ops only.
    z = x * 0.7071067811865476
    s = jnp.where(z < 0.0, -1.0, 1.0)
    az = jnp.abs(z)
    t = 1.0 / (1.0 + 0.3275911 * az)
    poly = ((((1.061405429 * t - 1.453152027) * t + 1.421413741) * t
             - 0.284496736) * t + 0.254829592) * t
    erf = s * (1.0 - poly * jnp.exp(-az * az))
    return 0.5 * x * (1.0 + erf)


def _interp_matrix_1d(out_size, in_size):
    # 1-D bilinear interpolation weights, align_corners=True semantics.
    A = np.zeros((out_size, in_size), dtype=np.float32)
    if in_size == 1 or out_size == 1:
        A[:, 0] = 1.0
        return A
    scale = (in_size - 1) / (out_size - 1)
    for o in range(out_size):
        src = o * scale
        lo = min(int(np.floor(src)), in_size - 1)
        hi = min(lo + 1, in_size - 1)
        frac = src - lo
        A[o, lo] += 1.0 - frac
        A[o, hi] += frac
    return A


# ----------------------------- Pallas kernels -------------------------------


def conv1x1_kernel(x_ref, w_ref, b_ref, o_ref, acc_ref):
    # x: (TM, TK), w: (TK, Cout), b: (1, Cout), o: (TM, Cout); K axis = grid 1.
    @pl.when(pl.program_id(1) == 0)
    def _():
        acc_ref[...] = jnp.zeros_like(acc_ref)

    acc_ref[...] += jnp.dot(x_ref[...], w_ref[...],
                            preferred_element_type=jnp.float32)

    @pl.when(pl.program_id(1) == pl.num_programs(1) - 1)
    def _():
        o_ref[...] = (acc_ref[...] + b_ref[...]).astype(o_ref.dtype)


def resize_h_kernel(a_ref, x_ref, o_ref):
    # a: (Hout, Hin), x: (1, Hin, TC), o: (1, Hout, TC)
    o_ref[0] = jnp.dot(a_ref[...], x_ref[0],
                       preferred_element_type=jnp.float32).astype(o_ref.dtype)


def resize_w_kernel(a_ref, x_ref, o_ref, *, TB):
    # a: (Wout, Win), x: (TB, Win, C), o: (TB, Wout, C)
    a = a_ref[...]
    for t in range(TB):
        o_ref[t] = jnp.dot(a, x_ref[t],
                           preferred_element_type=jnp.float32).astype(o_ref.dtype)


def resize_w_add_kernel(a_ref, x_ref, y_ref, o_ref, *, TB):
    # Same as resize_w_kernel but fuses "+ y" (up_and_add).
    a = a_ref[...]
    for t in range(TB):
        o_ref[t] = (jnp.dot(a, x_ref[t], preferred_element_type=jnp.float32)
                    + y_ref[t]).astype(o_ref.dtype)


def conv3x3_kernel(x0_ref, x1_ref, x2_ref, w_ref, b_ref, o_ref,
                   *, W, apply_gelu):
    # xk_ref: (1, 1, W+2, Cin) = padded input row (h + k), k in {0,1,2}
    # w_ref : (9, Cin, Cout) resident VMEM block ; b_ref: (1, Cout)
    # o_ref : (1, 1, W, Cout) output row (n, h)
    Cout = w_ref.shape[-1]
    rows = (x0_ref[0, 0], x1_ref[0, 0], x2_ref[0, 0])   # each (W+2, Cin)
    acc = jnp.zeros((W, Cout), jnp.float32)
    for dh in range(3):                    # statically unrolled 9-tap conv
        row = rows[dh]
        for dw in range(3):
            acc = acc + jnp.dot(row[dw:dw + W, :], w_ref[3 * dh + dw],
                                preferred_element_type=jnp.float32)
    acc = acc + b_ref[...]
    if apply_gelu:
        acc = _gelu_exact(acc)
    o_ref[0, 0] = acc.astype(o_ref.dtype)


# ------------------------------ Wrappers -------------------------------------


def conv1x1(x, w, b):
    N, H, W, Cin = x.shape
    Cout = w.shape[1]
    M = N * H * W
    TM = 512 if M > 512 else M
    TK = 512 if (Cin > 512 and Cin % 512 == 0) else Cin
    grid = (pl.cdiv(M, TM), pl.cdiv(Cin, TK))
    out = pl.pallas_call(
        conv1x1_kernel,
        grid=grid,
        in_specs=[pl.BlockSpec((TM, TK), lambda i, k: (i, k)),
                  pl.BlockSpec((TK, Cout), lambda i, k: (k, 0)),
                  pl.BlockSpec((1, Cout), lambda i, k: (0, 0))],
        out_specs=pl.BlockSpec((TM, Cout), lambda i, k: (i, 0)),
        out_shape=jax.ShapeDtypeStruct((M, Cout), x.dtype),
        scratch_shapes=[pltpu.VMEM((TM, Cout), jnp.float32)],
        compiler_params=pltpu.CompilerParams(
            dimension_semantics=("parallel", "arbitrary")),
    )(x.reshape(M, Cin), w, b.reshape(1, Cout))
    return out.reshape(N, H, W, Cout)


def _resize_h(x, Hout):
    # Bilinear (align_corners=True) resize along H only: Ah @ x.
    N, Hin, Wx, C = x.shape
    WC = Wx * C
    Ah = jnp.asarray(_interp_matrix_1d(Hout, Hin))
    TC = WC if WC <= 4096 else 2048           # 2048 is a multiple of 128
    grid = (N, pl.cdiv(WC, TC))
    out = pl.pallas_call(
        resize_h_kernel,
        grid=grid,
        in_specs=[pl.BlockSpec((Hout, Hin), lambda n, c: (0, 0)),
                  pl.BlockSpec((1, Hin, TC), lambda n, c: (n, 0, c))],
        out_specs=pl.BlockSpec((1, Hout, TC), lambda n, c: (n, 0, c)),
        out_shape=jax.ShapeDtypeStruct((N, Hout, WC), x.dtype),
        compiler_params=pltpu.CompilerParams(
            dimension_semantics=("parallel", "parallel")),
    )(Ah, x.reshape(N, Hin, WC))
    return out.reshape(N, Hout, Wx, C)


def _resize_w(x, Wout, y=None):
    # Bilinear (align_corners=True) resize along W; optionally fused "+ y".
    N, Hy, Win, C = x.shape
    Aw = jnp.asarray(_interp_matrix_1d(Wout, Win))
    R = N * Hy
    TB = min(R, 8)
    grid = (pl.cdiv(R, TB),)
    xr = x.reshape(R, Win, C)
    cp = pltpu.CompilerParams(dimension_semantics=("parallel",))
    if y is None:
        out = pl.pallas_call(
            functools.partial(resize_w_kernel, TB=TB),
            grid=grid,
            in_specs=[pl.BlockSpec((Wout, Win), lambda r: (0, 0)),
                      pl.BlockSpec((TB, Win, C), lambda r: (r, 0, 0))],
            out_specs=pl.BlockSpec((TB, Wout, C), lambda r: (r, 0, 0)),
            out_shape=jax.ShapeDtypeStruct((R, Wout, C), x.dtype),
            compiler_params=cp,
        )(Aw, xr)
    else:
        yr = y.reshape(R, Wout, C)
        out = pl.pallas_call(
            functools.partial(resize_w_add_kernel, TB=TB),
            grid=grid,
            in_specs=[pl.BlockSpec((Wout, Win), lambda r: (0, 0)),
                      pl.BlockSpec((TB, Win, C), lambda r: (r, 0, 0)),
                      pl.BlockSpec((TB, Wout, C), lambda r: (r, 0, 0))],
            out_specs=pl.BlockSpec((TB, Wout, C), lambda r: (r, 0, 0)),
            out_shape=jax.ShapeDtypeStruct((R, Wout, C), x.dtype),
            compiler_params=cp,
        )(Aw, xr, yr)
    return out.reshape(N, Hy, Wout, C)


def up_and_add(x, y):
    # F.interpolate(x, size=y.spatial, bilinear, align_corners=True) + y
    _, Hy, Wy, _ = y.shape
    return _resize_w(_resize_h(x, Hy), Wy, y=y)


def bilinear_resize(x, Hout, Wout):
    return _resize_w(_resize_h(x, Hout), Wout)


def conv3x3(x, w, b, *, apply_gelu=False):
    # 3x3 conv, padding=1.  Halo handled by three row-offset BlockSpecs on the
    # zero-padded input (pure auto-pipelining, one output row per grid step).
    N, H, W, Cin = x.shape
    Cout = w.shape[-1]
    xp = jnp.pad(x, ((0, 0), (1, 1), (1, 1), (0, 0)))   # padding=1, zeros
    w9 = w.reshape(9, Cin, Cout)
    row_specs = [
        pl.BlockSpec((1, 1, W + 2, Cin), lambda n, h, k=k: (n, h + k, 0, 0))
        for k in range(3)]
    kern = functools.partial(conv3x3_kernel, W=W, apply_gelu=apply_gelu)
    out = pl.pallas_call(
        kern,
        grid=(N, H),
        in_specs=row_specs + [
            pl.BlockSpec((9, Cin, Cout), lambda n, h: (0, 0, 0)),
            pl.BlockSpec((1, Cout), lambda n, h: (0, 0))],
        out_specs=pl.BlockSpec((1, 1, W, Cout), lambda n, h: (n, h, 0, 0)),
        out_shape=jax.ShapeDtypeStruct((N, H, W, Cout), x.dtype),
        compiler_params=pltpu.CompilerParams(
            dimension_semantics=("parallel", "arbitrary")),
    )(xp, xp, xp, w9, b.reshape(1, Cout))
    return out


# ------------------------------ FPN_fuse -------------------------------------


def init_params(key, feature_channels, fpn_out):
    assert feature_channels[0] == fpn_out
    ks = jax.random.split(key, 6)
    params = {"conv1x1_w": [], "conv1x1_b": []}
    for i, c in enumerate(feature_channels[1:]):
        params["conv1x1_w"].append(
            0.1 * jax.random.normal(jax.random.fold_in(ks[0], i), (c, fpn_out),
                                    jnp.float32))
        params["conv1x1_b"].append(
            0.1 * jax.random.normal(jax.random.fold_in(ks[1], i), (fpn_out,),
                                    jnp.float32))
    # NOTE: the PyTorch ModuleList is [conv]*3, i.e. one shared smooth conv.
    params["smooth_w"] = 0.1 * jax.random.normal(ks[2], (3, 3, fpn_out, fpn_out),
                                                 jnp.float32)
    params["smooth_b"] = 0.1 * jax.random.normal(ks[3], (fpn_out,), jnp.float32)
    cin = len(feature_channels) * fpn_out
    params["fusion_w"] = 0.1 * jax.random.normal(ks[4], (3, 3, cin, fpn_out),
                                                 jnp.float32)
    # BatchNorm2d(fpn_out) parameters (PyTorch fresh-init values).
    params["bn_gamma"] = jnp.ones((fpn_out,), jnp.float32)
    params["bn_beta"] = jnp.zeros((fpn_out,), jnp.float32)
    params["bn_mean"] = jnp.zeros((fpn_out,), jnp.float32)
    params["bn_var"] = jnp.ones((fpn_out,), jnp.float32)
    return params


def fpn_fuse_forward(features, params, eps=1e-5):
    feats = list(features)
    # 1x1 lateral convs on features[1:]
    for i in range(1, len(feats)):
        feats[i] = conv1x1(feats[i], params["conv1x1_w"][i - 1],
                           params["conv1x1_b"][i - 1])
    n = len(feats)
    # up_and_add (not cumulative, exactly as in the reference)
    P = [up_and_add(feats[i], feats[i - 1]) for i in reversed(range(1, n))]
    # shared smooth conv
    P = [conv3x3(p, params["smooth_w"], params["smooth_b"], apply_gelu=False)
         for p in P]
    P = list(reversed(P))
    P.append(feats[-1])
    H, W = P[0].shape[1], P[0].shape[2]
    P[1:] = [bilinear_resize(p, H, W) for p in P[1:]]
    x = jnp.concatenate(P, axis=-1)
    # conv_fusion: bias-free 3x3 conv + inference BatchNorm (folded) + GELU.
    inv_std = params["bn_gamma"] / jnp.sqrt(params["bn_var"] + eps)
    w_fold = params["fusion_w"] * inv_std            # per-out-channel scale
    b_fold = params["bn_beta"] - params["bn_mean"] * inv_std
    return conv3x3(x, w_fold, b_fold, apply_gelu=True)


# --------------------------------- Main ---------------------------------------

if __name__ == "__main__":
    feature_channels = [8, 16, 32, 64]   # small stand-in for [256,512,1024,2048]
    fpn_out = 8
    N = 2
    spatials = [16, 8, 4, 2]             # pyramid spatial sizes (NHWC)

    key = jax.random.PRNGKey(0)
    pkey, *fkeys = jax.random.split(key, 1 + len(feature_channels))
    features = [jax.random.normal(fk, (N, s, s, c), jnp.float32)
                for fk, s, c in zip(fkeys, spatials, feature_channels)]

    params = init_params(pkey, feature_channels, fpn_out)
    out = fpn_fuse_forward(features, params)
    out = jax.block_until_ready(out)
    assert out.shape == (N, spatials[0], spatials[0], fpn_out), out.shape
    assert bool(jnp.all(jnp.isfinite(out)))
    print("KERNEL_OK")
</pallas_src>

<mosaic_0001>
module attributes {stable_mosaic.version = 11 : i64} {
  func.func @conv1x1_kernel(%arg0: i32, %arg1: i32, %arg2: memref<128x16xf32, #tpu.memory_space<vmem>>, %arg3: memref<16x8xf32, #tpu.memory_space<vmem>>, %arg4: memref<1x8xf32, #tpu.memory_space<vmem>>, %arg5: memref<128x8xf32, #tpu.memory_space<vmem>>, %arg6: memref<128x8xf32, #tpu.memory_space<vmem>>) attributes {dimension_semantics = [#tpu.dimension_semantics<parallel>, #tpu.dimension_semantics<arbitrary>], iteration_bounds = array<i64: 1, 1>, scalar_prefetch = 0 : i64, scratch_operands = 1 : i64, tpu.core_type = #tpu.core_type<tc>, window_params = [{transform_indices = @transform_0, window_bounds = array<i64: 128, 16>}, {transform_indices = @transform_1, window_bounds = array<i64: 16, 8>}, {pipeline_mode = #tpu.pipeline_mode<synchronous>, transform_indices = @transform_2, window_bounds = array<i64: 1, 8>}, {transform_indices = @transform_3, window_bounds = array<i64: 128, 8>}]} {
    %c0_i32 = arith.constant 0 : i32
    %0 = arith.cmpi eq, %arg1, %c0_i32 : i32
    %1 = arith.extui %0 : i1 to i32
    %c0_i32_0 = arith.constant 0 : i32
    %2 = arith.cmpi ne, %1, %c0_i32_0 : i32
    scf.if %2 {
      %cst_10 = arith.constant 0.000000e+00 : f32
      %12 = vector.broadcast %cst_10 : f32 to vector<128x8xf32>
      %c0_11 = arith.constant 0 : index
      %c0_12 = arith.constant 0 : index
      %13 = vector.load %arg6[%c0_11, %c0_12] : memref<128x8xf32, #tpu.memory_space<vmem>>, vector<128x8xf32>
      tpu.vector_store %arg6[%c0_11, %c0_12], %12 {strides = array<i32>} : memref<128x8xf32, #tpu.memory_space<vmem>>, vector<128x8xf32>,
    } else {
    }
    %c0 = arith.constant 0 : index
    %c0_1 = arith.constant 0 : index
    %3 = vector.load %arg6[%c0, %c0_1] : memref<128x8xf32, #tpu.memory_space<vmem>>, vector<128x8xf32>
    %c0_2 = arith.constant 0 : index
    %c0_3 = arith.constant 0 : index
    %4 = vector.load %arg2[%c0_2, %c0_3] : memref<128x16xf32, #tpu.memory_space<vmem>>, vector<128x16xf32>
    %c0_4 = arith.constant 0 : index
    %c0_5 = arith.constant 0 : index
    %5 = vector.load %arg3[%c0_4, %c0_5] : memref<16x8xf32, #tpu.memory_space<vmem>>, vector<16x8xf32>
    %cst = arith.constant dense<0.000000e+00> : vector<128x8xf32>
    %6 = tpu.matmul %4, %5, %cst {dimension_numbers = #tpu.dot_dimension_numbers<[1], [0], [0], [1], [0, 0, 1, 1], [], []>} : vector<128x16xf32>, vector<16x8xf32>, vector<128x8xf32> -> vector<128x8xf32>
    %7 = arith.addf %3, %6 : vector<128x8xf32>
    %c0_6 = arith.constant 0 : index
    %c0_7 = arith.constant 0 : index
    %8 = vector.load %arg6[%c0_6, %c0_7] : memref<128x8xf32, #tpu.memory_space<vmem>>, vector<128x8xf32>
    tpu.vector_store %arg6[%c0_6, %c0_7], %7 {strides = array<i32>} : memref<128x8xf32, #tpu.memory_space<vmem>>, vector<128x8xf32>,
    %c0_i32_8 = arith.constant 0 : i32
    %9 = arith.cmpi eq, %arg1, %c0_i32_8 : i32
    %10 = arith.extui %9 : i1 to i32
    %c0_i32_9 = arith.constant 0 : i32
    %11 = arith.cmpi ne, %10, %c0_i32_9 : i32
    scf.if %11 {
      %c0_10 = arith.constant 0 : index
      %c0_11 = arith.constant 0 : index
      %12 = vector.load %arg6[%c0_10, %c0_11] : memref<128x8xf32, #tpu.memory_space<vmem>>, vector<128x8xf32>
      %c0_12 = arith.constant 0 : index
      %c0_13 = arith.constant 0 : index
      %13 = vector.load %arg4[%c0_12, %c0_13] : memref<1x8xf32, #tpu.memory_space<vmem>>, vector<1x8xf32>
      %14 = vector.broadcast %13 : vector<1x8xf32> to vector<128x8xf32>
      %15 = arith.addf %12, %14 : vector<128x8xf32>
      %c0_14 = arith.constant 0 : index
      %c0_15 = arith.constant 0 : index
      %16 = vector.load %arg5[%c0_14, %c0_15] : memref<128x8xf32, #tpu.memory_space<vmem>>, vector<128x8xf32>
      tpu.vector_store %arg5[%c0_14, %c0_15], %15 {strides = array<i32>} : memref<128x8xf32, #tpu.memory_space<vmem>>, vector<128x8xf32>,
    } else {
    }
    return
  }
  func.func @transform_0(%arg0: i32, %arg1: i32) -> (i32, i32) {
    %c0_i32 = arith.constant 0 : i32
    return %arg0, %arg1 : i32, i32
  }
  func.func @transform_1(%arg0: i32, %arg1: i32) -> (i32, i32) {
    %c0_i32 = arith.constant 0 : i32
    %c0_i32_0 = arith.constant 0 : i32
    return %arg1, %c0_i32 : i32, i32
  }
  func.func @transform_2(%arg0: i32, %arg1: i32) -> (i32, i32) {
    %c0_i32 = arith.constant 0 : i32
    %c0_i32_0 = arith.constant 0 : i32
    %c0_i32_1 = arith.constant 0 : i32
    return %c0_i32, %c0_i32_0 : i32, i32
  }
  func.func @transform_3(%arg0: i32, %arg1: i32) -> (i32, i32) {
    %c0_i32 = arith.constant 0 : i32
    %c0_i32_0 = arith.constant 0 : i32
    return %arg0, %c0_i32 : i32, i32
  }
}

</mosaic_0001>

<bundles_post_ra>
// kernel: tpu_custom_call.1
= control target key start
LH: loop header
LB: loop body
LE: loop exit
PB: predicated region body
PF: predicated region fallthrough
CT: control target
= control target key end

     0   :  { %vm69_vm0 = vcmask 130048   ;;  %vm18_vm1 = vcmask 64512   ;;  %v428_v3 = vmov 0.0   ;;  %s636_s1 = inlined_call_operand.vmem [shape: f32[16,8], index: 1, kind: input, shape index: {}]   ;;  %s637_s0 = inlined_call_operand.vmem [shape: f32[128,16], index: 0, kind: input, shape index: {}]   ;;  %s638_s2 = inlined_call_operand.vmem [shape: f32[1,8], index: 2, kind: input, shape index: {}]   ;;  %s639_s3 = inlined_call_operand.vmem [shape: f32[128,8], index: 3, kind: output, shape index: {}]  }
   0x1   :  { %v67_v0 = vld [vmem:[%s636_s1] sm:$0xff]  ;;  %v68_v1 = vld [vmem:[%s636_s1 + $0x8] sm:$0xff]  ;;  %20 = vst.msk [vmem:[#allocation2 + $0x8] sm:$0xff] %vm18_vm1, %v428_v3  ;;  %19 = vst.msk [vmem:[#allocation2] sm:$0xff] %vm18_vm1, %v428_v3 }
   0x2   :  { %v51_v2 = vld [vmem:[%s637_s0] sm:$0xff]  ;;  %21 = vst.msk [vmem:[#allocation2 + $0x10] sm:$0xff] %vm18_vm1, %v428_v3  ;;  %22 = vst.msk [vmem:[#allocation2 + $0x18] sm:$0xff] %vm18_vm1, %v428_v3  ;;  %v421_v4 = vpack.c.bf16 %v68_v1, %v67_v0  ;;  %v52_v6 = vld [vmem:[%s637_s0 + $0x8] sm:$0xff] }
   0x3   :  { %23 = vst.msk [vmem:[#allocation2 + $0x20] sm:$0xff] %vm18_vm1, %v428_v3  ;;  %24 = vst.msk [vmem:[#allocation2 + $0x28] sm:$0xff] %vm18_vm1, %v428_v3  ;;  %397 = vmatprep.mubr.msk.f32.mxu0 %vm69_vm0, %v51_v2  ;;  %v59_v5 = vld [vmem:[%s637_s0 + $0x40] sm:$0xff]  ;;  %v60_v7 = vld [vmem:[%s637_s0 + $0x48] sm:$0xff] }
   0x4   :  { %25 = vst.msk [vmem:[#allocation2 + $0x30] sm:$0xff] %vm18_vm1, %v428_v3  ;;  %26 = vst.msk [vmem:[#allocation2 + $0x38] sm:$0xff] %vm18_vm1, %v428_v3  ;;  %409 = vmatprep.mubr.msk.f32.mxu1 %vm69_vm0, %v59_v5  ;;  %422 = vmatprep.subr.bf16.mxu0 %v421_v4  ;;  %v53_v8 = vld [vmem:[%s637_s0 + $0x10] sm:$0xff]  ;;  %v54_v10 = vld [vmem:[%s637_s0 + $0x18] sm:$0xff] }
   0x5   :  { %27 = vst.msk [vmem:[#allocation2 + $0x40] sm:$0xff] %vm18_vm1, %v428_v3  ;;  %28 = vst.msk [vmem:[#allocation2 + $0x48] sm:$0xff] %vm18_vm1, %v428_v3  ;;  %425 = vmatprep.subr.bf16.mxu1 %v421_v4  ;;  %424 = vmatpush3.bf16.msra.mxu0 %v421_v4  ;;  %v61_v9 = vld [vmem:[%s637_s0 + $0x50] sm:$0xff]  ;;  %v62_v11 = vld [vmem:[%s637_s0 + $0x58] sm:$0xff] }
   0x6   :  { %29 = vst.msk [vmem:[#allocation2 + $0x50] sm:$0xff] %vm18_vm1, %v428_v3  ;;  %30 = vst.msk [vmem:[#allocation2 + $0x58] sm:$0xff] %vm18_vm1, %v428_v3  ;;  %426 = vmatpush3.bf16.msra.mxu1 %v421_v4  ;;  %v55_v12 = vld [vmem:[%s637_s0 + $0x20] sm:$0xff]  ;;  %v56_v14 = vld [vmem:[%s637_s0 + $0x28] sm:$0xff] }
   0x7   :  { %31 = vst.msk [vmem:[#allocation2 + $0x60] sm:$0xff] %vm18_vm1, %v428_v3  ;;  %32 = vst.msk [vmem:[#allocation2 + $0x68] sm:$0xff] %vm18_vm1, %v428_v3  ;;  %v63_v13 = vld [vmem:[%s637_s0 + $0x60] sm:$0xff]  ;;  %v64_v15 = vld [vmem:[%s637_s0 + $0x68] sm:$0xff] }
   0x8   :  { %33 = vst.msk [vmem:[#allocation2 + $0x70] sm:$0xff] %vm18_vm1, %v428_v3  ;;  %34 = vst.msk [vmem:[#allocation2 + $0x78] sm:$0xff] %vm18_vm1, %v428_v3  ;;  %398 = vmatmul.mubr.msk.f32.vlgmr.msra.gmra.mrb[0].mxu0 %vm69_vm0, %v52_v6  ;;  %v57_v16 = vld [vmem:[%s637_s0 + $0x30] sm:$0xff]  ;;  %v58_v18 = vld [vmem:[%s637_s0 + $0x38] sm:$0xff] }
   0x9   :  { %410 = vmatmul.mubr.msk.f32.vlgmr.msra.gmra.mrb[0].mxu1 %vm69_vm0, %v60_v7  ;;  %400 = vmatprep.mubr.msk.f32.mxu0 %vm69_vm0, %v53_v8  ;;  %v65_v17 = vld [vmem:[%s637_s0 + $0x70] sm:$0xff]  ;;  %v66_v19 = vld [vmem:[%s637_s0 + $0x78] sm:$0xff]  ;;  %v36_v20 = vld [vmem:[#allocation2 + $0x8] sm:$0xff] }
   0xa   :  { %412 = vmatprep.mubr.msk.f32.mxu1 %vm69_vm0, %v61_v9  ;;  %v35_v22 = vld [vmem:[#allocation2] sm:$0xff]  ;;  %v38_v32 = vld [vmem:[#allocation2 + $0x18] sm:$0xff]  ;;  %v37_v34 = vld [vmem:[#allocation2 + $0x10] sm:$0xff] }
   0xb   :  { %v40_v44 = vld [vmem:[#allocation2 + $0x28] sm:$0xff]  ;;  %v39_v46 = vld [vmem:[#allocation2 + $0x20] sm:$0xff]  ;;  %v42_v55 = vld [vmem:[#allocation2 + $0x38] sm:$0xff] }
   0xc   :  { %401 = vmatmul.mubr.msk.f32.gmra.mrb[2].mxu0 %vm69_vm0, %v54_v10  ;;  %v44_v21 = vld [vmem:[#allocation2 + $0x48] sm:$0xff]  ;;  %v43_v23 = vld [vmem:[#allocation2 + $0x40] sm:$0xff]  ;;  %v41_v61 = vld [vmem:[#allocation2 + $0x30] sm:$0xff] }
   0xd   :  { %413 = vmatmul.mubr.msk.f32.gmra.mrb[2].mxu1 %vm69_vm0, %v62_v11  ;;  %403 = vmatprep.mubr.msk.f32.mxu0 %vm69_vm0, %v55_v12  ;;  %v46_v33 = vld [vmem:[#allocation2 + $0x58] sm:$0xff]  ;;  %v45_v35 = vld [vmem:[#allocation2 + $0x50] sm:$0xff]  ;;  %v544_v48 = vld [vmem:[%s638_s2] ss:$0 sm:$0xff] }
   0xe   :  { %415 = vmatprep.mubr.msk.f32.mxu1 %vm69_vm0, %v63_v13  ;;  %v48_v45 = vld [vmem:[#allocation2 + $0x68] sm:$0xff]  ;;  %v47_v47 = vld [vmem:[#allocation2 + $0x60] sm:$0xff] }
   0xf   :  { %v50_v56 = vld [vmem:[#allocation2 + $0x78] sm:$0xff]  ;;  %v49_v2 = vld [vmem:[#allocation2 + $0x70] sm:$0xff] }
  0x10   :  { %404 = vmatmul.mubr.msk.f32.gmra.mrb[4].mxu0 %vm69_vm0, %v56_v14 }
  0x11   :  { %416 = vmatmul.mubr.msk.f32.gmra.mrb[4].mxu1 %vm69_vm0, %v64_v15  ;;  %406 = vmatprep.mubr.msk.f32.mxu0 %vm69_vm0, %v57_v16 }
  0x12   :  { %418 = vmatprep.mubr.msk.f32.mxu1 %vm69_vm0, %v65_v17 }
  0x14   :  { %407 = vmatmul.mubr.msk.f32.gmra.mrb[6].mxu0 %vm69_vm0, %v58_v18 }
  0x15   :  { %419 = vmatmul.mubr.msk.f32.gmra.mrb[6].mxu1 %vm69_vm0, %v66_v19 }
  0xdb   :  { %v399_v24 = vpop.f32.mrb[0].mxu0 }
  0xdc   :  { %v411_v25 = vpop.f32.mrb[0].mxu1  ;;  %v264_v26 = vadd.f32 %v399_v24, %v36_v20  ;;  %v184_v28 = vpop.f32.mrb[1].mxu0 }
  0xdd   :  { %v272_v27 = vadd.f32 %v411_v25, %v44_v21  ;;  %v224_v29 = vpop.f32.mrb[1].mxu1  ;;  %v263_v30 = vadd.f32 %v184_v28, %v35_v22 }
  0xde   :  { %v271_v31 = vadd.f32 %v224_v29, %v43_v23  ;;  %281 = vst.msk [vmem:[#allocation2 + $0x8] sm:$0xff] %vm18_vm1, %v264_v26 }
  0xdf   :  { %289 = vst.msk [vmem:[#allocation2 + $0x48] sm:$0xff] %vm18_vm1, %v272_v27  ;;  %280 = vst.msk [vmem:[#allocation2] sm:$0xff] %vm18_vm1, %v263_v30  ;;  %v402_v36 = vpop.f32.mrb[2].mxu0 }
  0xe0   :  { %288 = vst.msk [vmem:[#allocation2 + $0x40] sm:$0xff] %vm18_vm1, %v271_v31  ;;  %v414_v37 = vpop.f32.mrb[2].mxu1  ;;  %v266_v38 = vadd.f32 %v402_v36, %v38_v32  ;;  %v194_v40 = vpop.f32.mrb[3].mxu0 }
  0xe1   :  { %v274_v39 = vadd.f32 %v414_v37, %v46_v33  ;;  %v234_v41 = vpop.f32.mrb[3].mxu1  ;;  %v265_v42 = vadd.f32 %v194_v40, %v37_v34 }
  0xe2   :  { %v273_v43 = vadd.f32 %v234_v41, %v45_v35  ;;  %283 = vst.msk [vmem:[#allocation2 + $0x18] sm:$0xff] %vm18_vm1, %v266_v38 }
  0xe3   :  { %291 = vst.msk [vmem:[#allocation2 + $0x58] sm:$0xff] %vm18_vm1, %v274_v39  ;;  %282 = vst.msk [vmem:[#allocation2 + $0x10] sm:$0xff] %vm18_vm1, %v265_v42  ;;  %v405_v49 = vpop.f32.mrb[4].mxu0 }
  0xe4   :  { %290 = vst.msk [vmem:[#allocation2 + $0x50] sm:$0xff] %vm18_vm1, %v273_v43  ;;  %v417_v50 = vpop.f32.mrb[4].mxu1  ;;  %v268_v51 = vadd.f32 %v405_v49, %v40_v44  ;;  %v204_v53 = vpop.f32.mrb[5].mxu0 }
  0xe5   :  { %v276_v52 = vadd.f32 %v417_v50, %v48_v45  ;;  %v244_v54 = vpop.f32.mrb[5].mxu1  ;;  %v300_v57 = vld [vmem:[#allocation2 + $0x8] sm:$0xff]  ;;  %v267_v59 = vadd.f32 %v204_v53, %v39_v46 }
  0xe6   :  { %v308_v58 = vld [vmem:[#allocation2 + $0x48] sm:$0xff]  ;;  %v275_v60 = vadd.f32 %v244_v54, %v47_v47  ;;  %v323_v62 = vadd.f32 %v544_v48, %v300_v57  ;;  %v299_v0 = vld [vmem:[#allocation2] sm:$0xff]  ;;  %285 = vst.msk [vmem:[#allocation2 + $0x28] sm:$0xff] %vm18_vm1, %v268_v51 }
  0xe7   :  { %v331_v63 = vadd.f32 %v544_v48, %v308_v58  ;;  %v307_v1 = vld [vmem:[#allocation2 + $0x40] sm:$0xff]  ;;  %293 = vst.msk [vmem:[#allocation2 + $0x68] sm:$0xff] %vm18_vm1, %v276_v52  ;;  %v322_v3 = vadd.f32 %v544_v48, %v299_v0  ;;  %284 = vst.msk [vmem:[#allocation2 + $0x20] sm:$0xff] %vm18_vm1, %v267_v59  ;;  %v408_v5 = vpop.f32.mrb[6].mxu0 }
  0xe8   :  { %v330_v4 = vadd.f32 %v544_v48, %v307_v1  ;;  %292 = vst.msk [vmem:[#allocation2 + $0x60] sm:$0xff] %vm18_vm1, %v275_v60  ;;  %v420_v6 = vpop.f32.mrb[6].mxu1  ;;  %339 = vst.msk [vmem:[%s639_s3 + $0x8] sm:$0xff] %vm18_vm1, %v323_v62  ;;  %v270_v7 = vadd.f32 %v408_v5, %v42_v55  ;;  %v214_v9 = vpop.f32.mrb[7].mxu0 }
  0xe9   :  { %347 = vst.msk [vmem:[%s639_s3 + $0x48] sm:$0xff] %vm18_vm1, %v331_v63  ;;  %v278_v8 = vadd.f32 %v420_v6, %v50_v56  ;;  %v254_v10 = vpop.f32.mrb[7].mxu1  ;;  %338 = vst.msk [vmem:[%s639_s3] sm:$0xff] %vm18_vm1, %v322_v3  ;;  %v302_v11 = vld [vmem:[#allocation2 + $0x18] sm:$0xff]  ;;  %v269_v13 = vadd.f32 %v214_v9, %v41_v61 }
  0xea   :  { %346 = vst.msk [vmem:[%s639_s3 + $0x40] sm:$0xff] %vm18_vm1, %v330_v4  ;;  %v310_v12 = vld [vmem:[#allocation2 + $0x58] sm:$0xff]  ;;  %v277_v14 = vadd.f32 %v254_v10, %v49_v2  ;;  %v325_v15 = vadd.f32 %v544_v48, %v302_v11  ;;  %v301_v17 = vld [vmem:[#allocation2 + $0x10] sm:$0xff]  ;;  %287 = vst.msk [vmem:[#allocation2 + $0x38] sm:$0xff] %vm18_vm1, %v270_v7 }
  0xeb   :  { %v333_v16 = vadd.f32 %v544_v48, %v310_v12  ;;  %v309_v18 = vld [vmem:[#allocation2 + $0x50] sm:$0xff]  ;;  %295 = vst.msk [vmem:[#allocation2 + $0x78] sm:$0xff] %vm18_vm1, %v278_v8  ;;  %v324_v19 = vadd.f32 %v544_v48, %v301_v17  ;;  %286 = vst.msk [vmem:[#allocation2 + $0x30] sm:$0xff] %vm18_vm1, %v269_v13 }
  0xec   :  { %v332_v20 = vadd.f32 %v544_v48, %v309_v18  ;;  %294 = vst.msk [vmem:[#allocation2 + $0x70] sm:$0xff] %vm18_vm1, %v277_v14  ;;  %341 = vst.msk [vmem:[%s639_s3 + $0x18] sm:$0xff] %vm18_vm1, %v325_v15 }
  0xed   :  { %349 = vst.msk [vmem:[%s639_s3 + $0x58] sm:$0xff] %vm18_vm1, %v333_v16  ;;  %340 = vst.msk [vmem:[%s639_s3 + $0x10] sm:$0xff] %vm18_vm1, %v324_v19  ;;  %v304_v21 = vld [vmem:[#allocation2 + $0x28] sm:$0xff] }
  0xee   :  { %348 = vst.msk [vmem:[%s639_s3 + $0x50] sm:$0xff] %vm18_vm1, %v332_v20  ;;  %v312_v22 = vld [vmem:[#allocation2 + $0x68] sm:$0xff]  ;;  %v327_v23 = vadd.f32 %v544_v48, %v304_v21  ;;  %v303_v25 = vld [vmem:[#allocation2 + $0x20] sm:$0xff] }
  0xef   :  { %v335_v24 = vadd.f32 %v544_v48, %v312_v22  ;;  %v311_v26 = vld [vmem:[#allocation2 + $0x60] sm:$0xff]  ;;  %v326_v27 = vadd.f32 %v544_v48, %v303_v25 }
  0xf0   :  { %v334_v28 = vadd.f32 %v544_v48, %v311_v26  ;;  %343 = vst.msk [vmem:[%s639_s3 + $0x28] sm:$0xff] %vm18_vm1, %v327_v23 }
  0xf1   :  { %351 = vst.msk [vmem:[%s639_s3 + $0x68] sm:$0xff] %vm18_vm1, %v335_v24  ;;  %342 = vst.msk [vmem:[%s639_s3 + $0x20] sm:$0xff] %vm18_vm1, %v326_v27  ;;  %v306_v29 = vld [vmem:[#allocation2 + $0x38] sm:$0xff] }
  0xf2   :  { %350 = vst.msk [vmem:[%s639_s3 + $0x60] sm:$0xff] %vm18_vm1, %v334_v28  ;;  %v314_v30 = vld [vmem:[#allocation2 + $0x78] sm:$0xff]  ;;  %v329_v31 = vadd.f32 %v544_v48, %v306_v29  ;;  %v305_v33 = vld [vmem:[#allocation2 + $0x30] sm:$0xff] }
  0xf3   :  { %v337_v32 = vadd.f32 %v544_v48, %v314_v30  ;;  %v313_v34 = vld [vmem:[#allocation2 + $0x70] sm:$0xff]  ;;  %v328_v35 = vadd.f32 %v544_v48, %v305_v33 }
  0xf4   :  { %v336_v36 = vadd.f32 %v544_v48, %v313_v34  ;;  %345 = vst.msk [vmem:[%s639_s3 + $0x38] sm:$0xff] %vm18_vm1, %v329_v31 }
  0xf5   :  { %353 = vst.msk [vmem:[%s639_s3 + $0x78] sm:$0xff] %vm18_vm1, %v337_v32  ;;  %344 = vst.msk [vmem:[%s639_s3 + $0x30] sm:$0xff] %vm18_vm1, %v328_v35 }
  0xf6   :  { %352 = vst.msk [vmem:[%s639_s3 + $0x70] sm:$0xff] %vm18_vm1, %v336_v36 }

</bundles_post_ra>
